<compile_context>
chip_gen: v6e
topology: v6e:2x2x1
jax: 0.10.0
libtpu: 0.0.40
codegen_flags: <defaults>
</compile_context>

<pallas_src>
import jax
import jax.numpy as jnp
from jax import lax
from jax.experimental import pallas as pl
from jax.experimental.pallas import tpu as pltpu


_GROUP = 8    # rows per semaphore slot (one grouped wait retires 8 row DMAs)
_NSLOTS = 32  # outstanding groups -> _NSLOTS * _GROUP rows in flight


def _round_up(x, m):
    return ((x + m - 1) // m) * m


def _embed_kernel(ids_ref, table_hbm, out_ref, sem):
    # ids_ref   : SMEM (1, TB) int32   (blocked id slab for this output tile)
    # table_hbm : HBM  (V, D)          (raw ref, memory_space=pl.ANY)
    # out_ref   : VMEM (TB, D)         (pipelined output tile)
    # sem       : DMA semaphores (_NSLOTS,)
    tb = out_ref.shape[0]            # static
    ngroups = tb // _GROUP           # static
    n_pro = min(_NSLOTS, ngroups)    # static

    def _align(x):
        # Alignment hint only helps traced offsets; static ints pass through.
        return x if isinstance(x, int) else pl.multiple_of(x, _GROUP)

    def _start_row(tok, row, slot):
        pltpu.make_async_copy(
            table_hbm.at[pl.ds(tok, 1), :],
            out_ref.at[pl.ds(row, 1), :],
            sem.at[slot],
        ).start()

    def _wait_group(g):
        # One wait retires the _GROUP row DMAs signalled on this slot: the
        # descriptor's byte count (_GROUP, D) equals the sum of the _GROUP
        # (1, D) signals.  Src is a placeholder (only bytes matter); dst is
        # the actual rows of group g.
        base = _align(g * _GROUP)
        pltpu.make_async_copy(
            table_hbm.at[pl.ds(0, _GROUP), :],
            out_ref.at[pl.ds(base, _GROUP), :],
            sem.at[g % _NSLOTS],
        ).wait()

    def _issue_group(g):
        base = _align(g * _GROUP)
        slot = g % _NSLOTS
        toks = [ids_ref[0, base + r] for r in range(_GROUP)]  # SMEM sld first
        for r in range(_GROUP):
            _start_row(toks[r], base + r, slot)

    # Prologue: fill the outstanding-DMA window.
    def _pro(g, c):
        _issue_group(g)
        return c
    lax.fori_loop(0, n_pro, _pro, 0)

    # Steady state: read the next group's ids (SMEM reads before the
    # semaphore wait), retire the oldest group on this slot, re-issue.
    if ngroups > n_pro:
        def _steady(g, c):
            base = _align(g * _GROUP)
            slot = g % _NSLOTS
            toks = [ids_ref[0, base + r] for r in range(_GROUP)]
            _wait_group(g - n_pro)          # frees this slot (n_pro == _NSLOTS)
            for r in range(_GROUP):
                _start_row(toks[r], base + r, slot)
            return c
        lax.fori_loop(n_pro, ngroups, _steady, 0, unroll=2)

    # Epilogue: drain the window so every row has landed before Pallas
    # writes this output tile back to HBM.
    for g in range(ngroups - n_pro, ngroups):
        _wait_group(g)


def t5_embed(token_ids, table, *, tile=512):
    """token_ids: (B, S) int, table: (V, D) float -> (B, S, D) float.

    `tile` must be a multiple of 8.  Keep tile <= 512 on v7x (64 MiB VMEM/TC);
    v5e/v6e (128 MiB) tolerate larger but 512 is already near the roofline.
    """
    B, S = token_ids.shape
    V, D = table.shape
    assert tile % _GROUP == 0, "row tile must be a multiple of the DMA group (8)"

    # Clamp ids so an out-of-range token can never produce an OOB DMA.
    flat_ids = jnp.clip(token_ids.reshape(-1).astype(jnp.int32), 0, V - 1)
    N = flat_ids.shape[0]

    # Shrink the tile if the whole problem fits in one tile; pad the tail.
    eff_tile = min(tile, _round_up(N, _GROUP))
    n_pad = _round_up(N, eff_tile)
    if n_pad != N:
        flat_ids = jnp.pad(flat_ids, (0, n_pad - N))
    num_tiles = n_pad // eff_tile
    ids2d = flat_ids.reshape(num_tiles, eff_tile)

    itemsize = jnp.dtype(table.dtype).itemsize
    # Double-buffered output tile + slack; capped so it always fits v7x VMEM.
    vmem_bytes = min(64 * 1024 * 1024,
                     max(32 * 1024 * 1024,
                         2 * eff_tile * D * itemsize + 4 * 1024 * 1024))

    grid_spec = pltpu.PrefetchScalarGridSpec(
        num_scalar_prefetch=0,
        grid=(num_tiles,),
        in_specs=[
            # Per-tile id slab lands in SMEM, pipelined with the grid.
            pl.BlockSpec((1, eff_tile), lambda i: (i, 0),
                         memory_space=pltpu.MemorySpace.SMEM),
            # Embedding table stays in HBM; rows are gathered by explicit DMA.
            pl.BlockSpec(memory_space=pl.ANY),
        ],
        out_specs=pl.BlockSpec((eff_tile, D), lambda i: (i, 0)),
        scratch_shapes=[pltpu.SemaphoreType.DMA((_NSLOTS,))],
    )

    out_flat = pl.pallas_call(
        _embed_kernel,
        out_shape=jax.ShapeDtypeStruct((n_pad, D), table.dtype),
        grid_spec=grid_spec,
        compiler_params=pltpu.CompilerParams(
            # Disjoint output tiles -> shardable across TCs (v7x megacore).
            dimension_semantics=("parallel",),
            vmem_limit_bytes=int(vmem_bytes),
        ),
        cost_estimate=pl.CostEstimate(
            flops=0,
            transcendentals=0,
            bytes_accessed=int(2 * n_pad * D * itemsize + n_pad * 4),
        ),
    )(ids2d, table)

    return out_flat[:N].reshape(B, S, D)


if __name__ == "__main__":
    # Small deterministic stand-in for T5-XXL embed_tokens (real shape:
    # vocab=32128, d_model=4096).
    key = jax.random.PRNGKey(0)
    k_tab, k_ids, k_ids2 = jax.random.split(key, 3)

    V, D = 512, 128
    table = jax.random.normal(k_tab, (V, D), dtype=jnp.float32)

    # Case 1: tiny batch (prologue/epilogue path only).
    B, S = 2, 8
    token_ids = jax.random.randint(k_ids, (B, S), 0, V, dtype=jnp.int32)
    out = jax.block_until_ready(t5_embed(token_ids, table))
    ref = table[token_ids]
    assert out.shape == (B, S, D)
    assert jnp.allclose(out, ref), "embedding gather mismatch (small)"

    # Case 2: exercises the steady-state DMA window, multiple tiles and the
    # padded tail (1040 tokens -> 3 tiles of 512 rows).
    B2, S2 = 2, 520
    token_ids2 = jax.random.randint(k_ids2, (B2, S2), 0, V, dtype=jnp.int32)
    out2 = jax.block_until_ready(t5_embed(token_ids2, table))
    ref2 = table[token_ids2]
    assert out2.shape == (B2, S2, D)
    assert jnp.allclose(out2, ref2), "embedding gather mismatch (steady-state)"

    print("KERNEL_OK")
</pallas_src>

<mosaic_0001>
module attributes {stable_mosaic.version = 11 : i64} {
  func.func @_embed_kernel(%arg0: i32, %arg1: memref<1x16xi32, #tpu.memory_space<smem>>, %arg2: memref<512x128xf32, #tpu.memory_space<any>>, %arg3: memref<16x128xf32, #tpu.memory_space<vmem>>, %arg4: memref<32x!tpu.dma_semaphore, #tpu.memory_space<semaphore_mem>>) attributes {dimension_semantics = [#tpu.dimension_semantics<parallel>], iteration_bounds = array<i64: 1>, scalar_prefetch = 0 : i64, scratch_operands = 1 : i64, tpu.core_type = #tpu.core_type<tc>, window_params = [{transform_indices = @transform_0, window_bounds = array<i64: 1, 16>}, {}, {transform_indices = @transform_2, window_bounds = array<i64: 16, 128>}]} {
    %c0_i32 = arith.constant 0 : i32
    %c2_i32 = arith.constant 2 : i32
    %0 = arith.addi %c0_i32, %c2_i32 : i32
    %c1_i32 = arith.constant 1 : i32
    scf.for %arg5 = %c0_i32 to %0 step %c1_i32  : i32 {
      %c8_i32_10 = arith.constant 8 : i32
      %9 = arith.muli %arg5, %c8_i32_10 : i32
      %10 = tpu.assume_multiple %9, 8 : i32
      %c32_i32 = arith.constant 32 : i32
      %c0_i32_11 = arith.constant 0 : i32
      %11 = arith.cmpi eq, %c32_i32, %c0_i32_11 : i32
      %c1_i32_12 = arith.constant 1 : i32
      %12 = arith.select %11, %c1_i32_12, %c32_i32 : i32
      %13 = arith.remsi %arg5, %12 : i32
      %c0_i32_13 = arith.constant 0 : i32
      %14 = arith.cmpi ne, %13, %c0_i32_13 : i32
      %c0_i32_14 = arith.constant 0 : i32
      %15 = arith.cmpi slt, %13, %c0_i32_14 : i32
      %c0_i32_15 = arith.constant 0 : i32
      %16 = arith.cmpi slt, %12, %c0_i32_15 : i32
      %17 = arith.xori %15, %16 : i1
      %18 = arith.andi %17, %14 : i1
      %19 = arith.addi %13, %12 : i32
      %20 = arith.select %18, %19, %13 : i32
      %c0_i32_16 = arith.constant 0 : i32
      %21 = arith.addi %10, %c0_i32_16 : i32
      %c0 = arith.constant 0 : index
      %22 = arith.index_cast %21 : i32 to index
      %23 = memref.load %arg1[%c0, %22] : memref<1x16xi32, #tpu.memory_space<smem>>
      %c1_i32_17 = arith.constant 1 : i32
      %24 = arith.addi %10, %c1_i32_17 : i32
      %c0_18 = arith.constant 0 : index
      %25 = arith.index_cast %24 : i32 to index
      %26 = memref.load %arg1[%c0_18, %25] : memref<1x16xi32, #tpu.memory_space<smem>>
      %c2_i32_19 = arith.constant 2 : i32
      %27 = arith.addi %10, %c2_i32_19 : i32
      %c0_20 = arith.constant 0 : index
      %28 = arith.index_cast %27 : i32 to index
      %29 = memref.load %arg1[%c0_20, %28] : memref<1x16xi32, #tpu.memory_space<smem>>
      %c3_i32 = arith.constant 3 : i32
      %30 = arith.addi %10, %c3_i32 : i32
      %c0_21 = arith.constant 0 : index
      %31 = arith.index_cast %30 : i32 to index
      %32 = memref.load %arg1[%c0_21, %31] : memref<1x16xi32, #tpu.memory_space<smem>>
      %c4_i32 = arith.constant 4 : i32
      %33 = arith.addi %10, %c4_i32 : i32
      %c0_22 = arith.constant 0 : index
      %34 = arith.index_cast %33 : i32 to index
      %35 = memref.load %arg1[%c0_22, %34] : memref<1x16xi32, #tpu.memory_space<smem>>
      %c5_i32 = arith.constant 5 : i32
      %36 = arith.addi %10, %c5_i32 : i32
      %c0_23 = arith.constant 0 : index
      %37 = arith.index_cast %36 : i32 to index
      %38 = memref.load %arg1[%c0_23, %37] : memref<1x16xi32, #tpu.memory_space<smem>>
      %c6_i32 = arith.constant 6 : i32
      %39 = arith.addi %10, %c6_i32 : i32
      %c0_24 = arith.constant 0 : index
      %40 = arith.index_cast %39 : i32 to index
      %41 = memref.load %arg1[%c0_24, %40] : memref<1x16xi32, #tpu.memory_space<smem>>
      %c7_i32 = arith.constant 7 : i32
      %42 = arith.addi %10, %c7_i32 : i32
      %c0_25 = arith.constant 0 : index
      %43 = arith.index_cast %42 : i32 to index
      %44 = memref.load %arg1[%c0_25, %43] : memref<1x16xi32, #tpu.memory_space<smem>>
      %c0_i32_26 = arith.constant 0 : i32
      %45 = arith.addi %10, %c0_i32_26 : i32
      %c0_i32_27 = arith.constant 0 : i32
      %46 = tpu.memref_slice %arg2[%23, %c0_i32_27] : memref<512x128xf32, #tpu.memory_space<any>> -> memref<1x128xf32, #tpu.memory_space<any>>
      %c0_i32_28 = arith.constant 0 : i32
      %47 = tpu.memref_slice %arg3[%45, %c0_i32_28] : memref<16x128xf32, #tpu.memory_space<vmem>> -> memref<1x128xf32, #tpu.memory_space<vmem>>
      %48 = tpu.memref_slice %arg4[%20] : memref<32x!tpu.dma_semaphore, #tpu.memory_space<semaphore_mem>> -> memref<1x!tpu.dma_semaphore, #tpu.memory_space<semaphore_mem>>
      %49 = tpu.memref_squeeze %48 : memref<1x!tpu.dma_semaphore, #tpu.memory_space<semaphore_mem>> -> memref<!tpu.dma_semaphore, #tpu.memory_space<semaphore_mem>>
      tpu.enqueue_dma source(%46 : memref<1x128xf32, #tpu.memory_space<any>>) target(%47 : memref<1x128xf32, #tpu.memory_space<vmem>>) target_semaphore(%49 : memref<!tpu.dma_semaphore, #tpu.memory_space<semaphore_mem>>)
      %c1_i32_29 = arith.constant 1 : i32
      %50 = arith.addi %10, %c1_i32_29 : i32
      %c0_i32_30 = arith.constant 0 : i32
      %51 = tpu.memref_slice %arg2[%26, %c0_i32_30] : memref<512x128xf32, #tpu.memory_space<any>> -> memref<1x128xf32, #tpu.memory_space<any>>
      %c0_i32_31 = arith.constant 0 : i32
      %52 = tpu.memref_slice %arg3[%50, %c0_i32_31] : memref<16x128xf32, #tpu.memory_space<vmem>> -> memref<1x128xf32, #tpu.memory_space<vmem>>
      %53 = tpu.memref_slice %arg4[%20] : memref<32x!tpu.dma_semaphore, #tpu.memory_space<semaphore_mem>> -> memref<1x!tpu.dma_semaphore, #tpu.memory_space<semaphore_mem>>
      %54 = tpu.memref_squeeze %53 : memref<1x!tpu.dma_semaphore, #tpu.memory_space<semaphore_mem>> -> memref<!tpu.dma_semaphore, #tpu.memory_space<semaphore_mem>>
      tpu.enqueue_dma source(%51 : memref<1x128xf32, #tpu.memory_space<any>>) target(%52 : memref<1x128xf32, #tpu.memory_space<vmem>>) target_semaphore(%54 : memref<!tpu.dma_semaphore, #tpu.memory_space<semaphore_mem>>)
      %c2_i32_32 = arith.constant 2 : i32
      %55 = arith.addi %10, %c2_i32_32 : i32
      %c0_i32_33 = arith.constant 0 : i32
      %56 = tpu.memref_slice %arg2[%29, %c0_i32_33] : memref<512x128xf32, #tpu.memory_space<any>> -> memref<1x128xf32, #tpu.memory_space<any>>
      %c0_i32_34 = arith.constant 0 : i32
      %57 = tpu.memref_slice %arg3[%55, %c0_i32_34] : memref<16x128xf32, #tpu.memory_space<vmem>> -> memref<1x128xf32, #tpu.memory_space<vmem>>
      %58 = tpu.memref_slice %arg4[%20] : memref<32x!tpu.dma_semaphore, #tpu.memory_space<semaphore_mem>> -> memref<1x!tpu.dma_semaphore, #tpu.memory_space<semaphore_mem>>
      %59 = tpu.memref_squeeze %58 : memref<1x!tpu.dma_semaphore, #tpu.memory_space<semaphore_mem>> -> memref<!tpu.dma_semaphore, #tpu.memory_space<semaphore_mem>>
      tpu.enqueue_dma source(%56 : memref<1x128xf32, #tpu.memory_space<any>>) target(%57 : memref<1x128xf32, #tpu.memory_space<vmem>>) target_semaphore(%59 : memref<!tpu.dma_semaphore, #tpu.memory_space<semaphore_mem>>)
      %c3_i32_35 = arith.constant 3 : i32
      %60 = arith.addi %10, %c3_i32_35 : i32
      %c0_i32_36 = arith.constant 0 : i32
      %61 = tpu.memref_slice %arg2[%32, %c0_i32_36] : memref<512x128xf32, #tpu.memory_space<any>> -> memref<1x128xf32, #tpu.memory_space<any>>
      %c0_i32_37 = arith.constant 0 : i32
      %62 = tpu.memref_slice %arg3[%60, %c0_i32_37] : memref<16x128xf32, #tpu.memory_space<vmem>> -> memref<1x128xf32, #tpu.memory_space<vmem>>
      %63 = tpu.memref_slice %arg4[%20] : memref<32x!tpu.dma_semaphore, #tpu.memory_space<semaphore_mem>> -> memref<1x!tpu.dma_semaphore, #tpu.memory_space<semaphore_mem>>
      %64 = tpu.memref_squeeze %63 : memref<1x!tpu.dma_semaphore, #tpu.memory_space<semaphore_mem>> -> memref<!tpu.dma_semaphore, #tpu.memory_space<semaphore_mem>>
      tpu.enqueue_dma source(%61 : memref<1x128xf32, #tpu.memory_space<any>>) target(%62 : memref<1x128xf32, #tpu.memory_space<vmem>>) target_semaphore(%64 : memref<!tpu.dma_semaphore, #tpu.memory_space<semaphore_mem>>)
      %c4_i32_38 = arith.constant 4 : i32
      %65 = arith.addi %10, %c4_i32_38 : i32
      %c0_i32_39 = arith.constant 0 : i32
      %66 = tpu.memref_slice %arg2[%35, %c0_i32_39] : memref<512x128xf32, #tpu.memory_space<any>> -> memref<1x128xf32, #tpu.memory_space<any>>
      %c0_i32_40 = arith.constant 0 : i32
      %67 = tpu.memref_slice %arg3[%65, %c0_i32_40] : memref<16x128xf32, #tpu.memory_space<vmem>> -> memref<1x128xf32, #tpu.memory_space<vmem>>
      %68 = tpu.memref_slice %arg4[%20] : memref<32x!tpu.dma_semaphore, #tpu.memory_space<semaphore_mem>> -> memref<1x!tpu.dma_semaphore, #tpu.memory_space<semaphore_mem>>
      %69 = tpu.memref_squeeze %68 : memref<1x!tpu.dma_semaphore, #tpu.memory_space<semaphore_mem>> -> memref<!tpu.dma_semaphore, #tpu.memory_space<semaphore_mem>>
      tpu.enqueue_dma source(%66 : memref<1x128xf32, #tpu.memory_space<any>>) target(%67 : memref<1x128xf32, #tpu.memory_space<vmem>>) target_semaphore(%69 : memref<!tpu.dma_semaphore, #tpu.memory_space<semaphore_mem>>)
      %c5_i32_41 = arith.constant 5 : i32
      %70 = arith.addi %10, %c5_i32_41 : i32
      %c0_i32_42 = arith.constant 0 : i32
      %71 = tpu.memref_slice %arg2[%38, %c0_i32_42] : memref<512x128xf32, #tpu.memory_space<any>> -> memref<1x128xf32, #tpu.memory_space<any>>
      %c0_i32_43 = arith.constant 0 : i32
      %72 = tpu.memref_slice %arg3[%70, %c0_i32_43] : memref<16x128xf32, #tpu.memory_space<vmem>> -> memref<1x128xf32, #tpu.memory_space<vmem>>
      %73 = tpu.memref_slice %arg4[%20] : memref<32x!tpu.dma_semaphore, #tpu.memory_space<semaphore_mem>> -> memref<1x!tpu.dma_semaphore, #tpu.memory_space<semaphore_mem>>
      %74 = tpu.memref_squeeze %73 : memref<1x!tpu.dma_semaphore, #tpu.memory_space<semaphore_mem>> -> memref<!tpu.dma_semaphore, #tpu.memory_space<semaphore_mem>>
      tpu.enqueue_dma source(%71 : memref<1x128xf32, #tpu.memory_space<any>>) target(%72 : memref<1x128xf32, #tpu.memory_space<vmem>>) target_semaphore(%74 : memref<!tpu.dma_semaphore, #tpu.memory_space<semaphore_mem>>)
      %c6_i32_44 = arith.constant 6 : i32
      %75 = arith.addi %10, %c6_i32_44 : i32
      %c0_i32_45 = arith.constant 0 : i32
      %76 = tpu.memref_slice %arg2[%41, %c0_i32_45] : memref<512x128xf32, #tpu.memory_space<any>> -> memref<1x128xf32, #tpu.memory_space<any>>
      %c0_i32_46 = arith.constant 0 : i32
      %77 = tpu.memref_slice %arg3[%75, %c0_i32_46] : memref<16x128xf32, #tpu.memory_space<vmem>> -> memref<1x128xf32, #tpu.memory_space<vmem>>
      %78 = tpu.memref_slice %arg4[%20] : memref<32x!tpu.dma_semaphore, #tpu.memory_space<semaphore_mem>> -> memref<1x!tpu.dma_semaphore, #tpu.memory_space<semaphore_mem>>
      %79 = tpu.memref_squeeze %78 : memref<1x!tpu.dma_semaphore, #tpu.memory_space<semaphore_mem>> -> memref<!tpu.dma_semaphore, #tpu.memory_space<semaphore_mem>>
      tpu.enqueue_dma source(%76 : memref<1x128xf32, #tpu.memory_space<any>>) target(%77 : memref<1x128xf32, #tpu.memory_space<vmem>>) target_semaphore(%79 : memref<!tpu.dma_semaphore, #tpu.memory_space<semaphore_mem>>)
      %c7_i32_47 = arith.constant 7 : i32
      %80 = arith.addi %10, %c7_i32_47 : i32
      %c0_i32_48 = arith.constant 0 : i32
      %81 = tpu.memref_slice %arg2[%44, %c0_i32_48] : memref<512x128xf32, #tpu.memory_space<any>> -> memref<1x128xf32, #tpu.memory_space<any>>
      %c0_i32_49 = arith.constant 0 : i32
      %82 = tpu.memref_slice %arg3[%80, %c0_i32_49] : memref<16x128xf32, #tpu.memory_space<vmem>> -> memref<1x128xf32, #tpu.memory_space<vmem>>
      %83 = tpu.memref_slice %arg4[%20] : memref<32x!tpu.dma_semaphore, #tpu.memory_space<semaphore_mem>> -> memref<1x!tpu.dma_semaphore, #tpu.memory_space<semaphore_mem>>
      %84 = tpu.memref_squeeze %83 : memref<1x!tpu.dma_semaphore, #tpu.memory_space<semaphore_mem>> -> memref<!tpu.dma_semaphore, #tpu.memory_space<semaphore_mem>>
      tpu.enqueue_dma source(%81 : memref<1x128xf32, #tpu.memory_space<any>>) target(%82 : memref<1x128xf32, #tpu.memory_space<vmem>>) target_semaphore(%84 : memref<!tpu.dma_semaphore, #tpu.memory_space<semaphore_mem>>)
    }
    %c2_i32_0 = arith.constant 2 : i32
    %c0_i32_1 = arith.constant 0 : i32
    %c0_i32_2 = arith.constant 0 : i32
    %c0_i32_3 = arith.constant 0 : i32
    %1 = tpu.memref_slice %arg2[%c0_i32_2, %c0_i32_3] : memref<512x128xf32, #tpu.memory_space<any>> -> memref<8x128xf32, #tpu.memory_space<any>>
    %c0_i32_4 = arith.constant 0 : i32
    %c0_i32_5 = arith.constant 0 : i32
    %2 = tpu.memref_slice %arg3[%c0_i32_4, %c0_i32_5] : memref<16x128xf32, #tpu.memory_space<vmem>> -> memref<8x128xf32, #tpu.memory_space<vmem>>
    %3 = tpu.memref_slice %arg4[%c0_i32_1] : memref<32x!tpu.dma_semaphore, #tpu.memory_space<semaphore_mem>> -> memref<1x!tpu.dma_semaphore, #tpu.memory_space<semaphore_mem>>
    %4 = tpu.memref_squeeze %3 : memref<1x!tpu.dma_semaphore, #tpu.memory_space<semaphore_mem>> -> memref<!tpu.dma_semaphore, #tpu.memory_space<semaphore_mem>>
    tpu.wait_dma2 semaphore(%4 : memref<!tpu.dma_semaphore, #tpu.memory_space<semaphore_mem>>) src(%1 : memref<8x128xf32, #tpu.memory_space<any>>) dst(%2 : memref<8x128xf32, #tpu.memory_space<vmem>>)
    %c1_i32_6 = arith.constant 1 : i32
    %c0_i32_7 = arith.constant 0 : i32
    %c0_i32_8 = arith.constant 0 : i32
    %5 = tpu.memref_slice %arg2[%c0_i32_7, %c0_i32_8] : memref<512x128xf32, #tpu.memory_space<any>> -> memref<8x128xf32, #tpu.memory_space<any>>
    %c8_i32 = arith.constant 8 : i32
    %c0_i32_9 = arith.constant 0 : i32
    %6 = tpu.memref_slice %arg3[%c8_i32, %c0_i32_9] : memref<16x128xf32, #tpu.memory_space<vmem>> -> memref<8x128xf32, #tpu.memory_space<vmem>>
    %7 = tpu.memref_slice %arg4[%c1_i32_6] : memref<32x!tpu.dma_semaphore, #tpu.memory_space<semaphore_mem>> -> memref<1x!tpu.dma_semaphore, #tpu.memory_space<semaphore_mem>>
    %8 = tpu.memref_squeeze %7 : memref<1x!tpu.dma_semaphore, #tpu.memory_space<semaphore_mem>> -> memref<!tpu.dma_semaphore, #tpu.memory_space<semaphore_mem>>
    tpu.wait_dma2 semaphore(%8 : memref<!tpu.dma_semaphore, #tpu.memory_space<semaphore_mem>>) src(%5 : memref<8x128xf32, #tpu.memory_space<any>>) dst(%6 : memref<8x128xf32, #tpu.memory_space<vmem>>)
    return
  }
  func.func @transform_0(%arg0: i32) -> (i32, i32) {
    %c0_i32 = arith.constant 0 : i32
    %c0_i32_0 = arith.constant 0 : i32
    return %arg0, %c0_i32 : i32, i32
  }
  func.func @transform_2(%arg0: i32) -> (i32, i32) {
    %c0_i32 = arith.constant 0 : i32
    %c0_i32_0 = arith.constant 0 : i32
    return %arg0, %c0_i32 : i32, i32
  }
}

</mosaic_0001>

<bundles_post_ra>
// kernel: tpu_custom_call.1
= control target key start
LH: loop header
LB: loop body
LE: loop exit
PB: predicated region body
PF: predicated region fallthrough
CT: control target
= control target key end

     0   :  { %7 = vsyncpa [#allocation5], 0  ;;  %s935_s0 = inlined_call_operand.hbm [shape: s32[1,16], index: 0, kind: input, shape index: {}]   ;;  %s936_s1 = inlined_call_operand.hbm [shape: f32[512,128], index: 1, kind: input, shape index: {}]   ;;  %s937_s2 = inlined_call_operand.hbm [shape: f32[16,128], index: 2, kind: output, shape index: {}]  }
   0x1   :  { %8 = vsyncpa [#allocation4], 0  ;;  %s742_s9 = smov [#allocation3]  }
   0x2   :  { %16 = dma.hbm_to_smem %s935_s0, 16, %s742_s9, [#allocation5]  }
   0x3   :  { %730 = dma.done.wait [#allocation5], 16  }
   0x4   :  { %731 = vsyncadd [#allocation5], 4294967280 }
   0x5   :  { %20 = sfence }
   0x6   :  { %s764_s12 = smov 0  }
   0x7 LB: > { %s770_s13 = sshll.u32 %s740_s12, 3  ;;  %p28_p0 = scmp.lt.s32.totalorder %s740_s12, 0  ;;  %s740_s12 = sphi %s764_s12, %s26_s12  }
   0x8   : > { %s29_s0 = ssub.s32 0, %s740_s12  ;;  %s40_s14 = sld [smem:[#allocation3 + %s770_s13]] }
   0x9   : > { %s460_s15 = smin.u32 %s740_s12, %s29_s0  ;;  %s777_s17 = scalar_lea.vmem [#allocation6], %s770_s13 }
   0xa   : > { %s31_s16 = sand.u32 31, %s460_s15   ;;  %s66_s18 = sshll.u32 %s777_s17, 4  ;;  %s780_s18 = int_to_ptr.vmem [resolvable:$true] %s66_s18 }
   0xb   : > { %s32_s19 = ssub.s32 0, %s31_s16  ;;  %s41_s20 = sadd.s32 1, %s770_s13 }
   0xc   : > { %s939_s19 = smov (!%p28_p0, %s32_s19), %s31_s16  ;;  %s423_s21 = scalar_lea.vmem %s777_s17, 1 [#allocation6] }
   0xd   : > { %p462_p1 = scmp.lt.s32.totalorder %s939_s19, 0  ;;  %s38_s22 = sadd.s32 32, %s939_s19 }
   0xe   : > { %s463_s23 = sshll.u32 %s40_s14, 4  ;;  %s784_s24 = sld [smem:[#allocation3 + %s41_s20]] }
   0xf   : > { %s941_s22 = smov (!%p462_p1, %s38_s22), %s939_s19  ;;  %s56_s27 = scalar_lea.hbm %s936_s1, %s463_s23 }
  0x10   : > { %s80_s28 = sshll.u32 %s423_s21, 4  ;;  %s791_s29 = scalar_lea.sflag [#allocation2], %s941_s22  ;;  %s789_s28 = int_to_ptr.vmem [resolvable:$true] %s80_s28 }
  0x11   : > { %s530_s30 = scalar_lea.hbm %s56_s27, 16  ;;  %s796_s5 = scalar_lea.hbm %s936_s1, 8192 }
  0x12   : > { %p531_p2 = scmp.ne.s32.totalorder %s56_s27, %s530_s30  ;;  %p533_p3 = scmp.lt.s32.totalorder %s56_s27, %s936_s1 }
  0x13   : > { %p534_p4 = scmp.lt.s32.totalorder %s796_s5, %s530_s30 }
  0x15   : > { %p535_p5 = por %p534_p4, %p533_p3 }
  0x17   : > { %p536_p6 = pnand %p535_p5, %p531_p2 }
  0x19   : > { %539 = shalt.err (!%p536_p6)  }
  0x1a   : > { %s540_s8 = scalar_lea.vmem %s780_s18, 16  ;;  %s743_s9 = smov [#allocation6]  }
  0x1b   : > { %p541_p7 = scmp.ne.s32.totalorder %s780_s18, %s540_s8  ;;  %s542_s10 = sshll.u32 %s743_s9, 4  ;;  %s804_s10 = int_to_ptr.vmem [resolvable:$false] %s542_s10 }
  0x1c   : > { %s807_s11 = scalar_lea.vmem %s804_s10, 256  ;;  %p545_p8 = scmp.lt.s32.totalorder %s780_s18, %s804_s10 }
  0x1d   : > { %p546_p9 = scmp.lt.s32.totalorder %s807_s11, %s540_s8 }
  0x1f   : > { %p547_p10 = por %p546_p9, %p545_p8 }
  0x21   : > { %p548_p11 = pnand %p547_p10, %p541_p7 }
  0x23   : > { %551 = shalt.err (!%p548_p11)  }
  0x24   : > { %69 = dma.hbm_to_vmem [thread:$0]  %s56_s27, 16, %s780_s18, %s791_s29 }
  0x25   : > { %s43_s0 = sadd.s32 2, %s770_s13  ;;  %s428_s14 = scalar_lea.vmem %s777_s17, 2 [#allocation6] }
  0x26   : > { %s464_s15 = sshll.u32 %s784_s24, 4  ;;  %s44_s16 = sld [smem:[#allocation3 + %s43_s0]] }
  0x27   : > { %s71_s21 = scalar_lea.hbm %s936_s1, %s464_s15  ;;  %s94_s22 = sshll.u32 %s428_s14, 4  ;;  %s95_s22 = int_to_ptr.vmem [resolvable:$true] %s94_s22 }
  0x28   : > { %s552_s23 = scalar_lea.hbm %s71_s21, 16  ;;  %p555_p13 = scmp.lt.s32.totalorder %s71_s21, %s936_s1 }
  0x29   : > { %p553_p12 = scmp.ne.s32.totalorder %s71_s21, %s552_s23  ;;  %p556_p0 = scmp.lt.s32.totalorder %s796_s5, %s552_s23 }
  0x2b   : > { %p557_p1 = por %p556_p0, %p555_p13 }
  0x2d   : > { %p558_p2 = pnand %p557_p1, %p553_p12 }
  0x2f   : > { %561 = shalt.err (!%p558_p2)  }
  0x30   : > { %s562_s18 = scalar_lea.vmem %s789_s28, 16  ;;  %p567_p4 = scmp.lt.s32.totalorder %s789_s28, %s804_s10 }
  0x31   : > { %p563_p3 = scmp.ne.s32.totalorder %s789_s28, %s562_s18  ;;  %p568_p5 = scmp.lt.s32.totalorder %s807_s11, %s562_s18 }
  0x33   : > { %p569_p6 = por %p568_p5, %p567_p4 }
  0x35   : > { %p570_p7 = pnand %p569_p6, %p563_p3 }
  0x37   : > { %573 = shalt.err (!%p570_p7)  }
  0x38   : > { %83 = dma.hbm_to_vmem [thread:$0]  %s71_s21, 16, %s789_s28, %s791_s29 }
  0x39   : > { %s45_s24 = sadd.s32 3, %s770_s13  ;;  %s433_s30 = scalar_lea.vmem %s777_s17, 3 [#allocation6] }
  0x3a   : > { %s46_s27 = sld [smem:[#allocation3 + %s45_s24]]  ;;  %s108_s3 = sshll.u32 %s433_s30, 4  ;;  %s834_s3 = int_to_ptr.vmem [resolvable:$true] %s108_s3 }
  0x3b   : > { %s47_s4 = sadd.s32 4, %s770_s13  ;;  %s466_s6 = sshll.u32 %s44_s16, 4 }
  0x3c   : > { %s85_s9 = scalar_lea.hbm %s936_s1, %s466_s6  ;;  %s839_s0 = sld [smem:[#allocation3 + %s47_s4]] }
  0x3d   : > { %s574_s14 = scalar_lea.hbm %s85_s9, 16  ;;  %p577_p9 = scmp.lt.s32.totalorder %s85_s9, %s936_s1 }
  0x3e   : > { %p575_p8 = scmp.ne.s32.totalorder %s85_s9, %s574_s14  ;;  %p578_p10 = scmp.lt.s32.totalorder %s796_s5, %s574_s14 }
  0x40   : > { %p579_p11 = por %p578_p10, %p577_p9 }
  0x42   : > { %p580_p12 = pnand %p579_p11, %p575_p8 }
  0x44   : > { %583 = shalt.err (!%p580_p12)  }
  0x45   : > { %s584_s28 = scalar_lea.vmem %s95_s22, 16  ;;  %p589_p0 = scmp.lt.s32.totalorder %s95_s22, %s804_s10 }
  0x46   : > { %p585_p13 = scmp.ne.s32.totalorder %s95_s22, %s584_s28  ;;  %p590_p1 = scmp.lt.s32.totalorder %s807_s11, %s584_s28 }
  0x48   : > { %p591_p2 = por %p590_p1, %p589_p0 }
  0x4a   : > { %p592_p3 = pnand %p591_p2, %p585_p13 }
  0x4c   : > { %595 = shalt.err (!%p592_p3)  }
  0x4d   : > { %97 = dma.hbm_to_vmem [thread:$0]  %s85_s9, 16, %s95_s22, %s791_s29 }
  0x4e   : > { %s438_s16 = scalar_lea.vmem %s777_s17, 4 [#allocation6]  ;;  %s49_s20 = sadd.s32 5, %s770_s13 }
  0x4f   : > { %s468_s21 = sshll.u32 %s46_s27, 4  ;;  %s122_s23 = sshll.u32 %s438_s16, 4  ;;  %s853_s23 = int_to_ptr.vmem [resolvable:$true] %s122_s23 }
  0x50   : > { %s99_s18 = scalar_lea.hbm %s936_s1, %s468_s21 }
  0x51   : > { %s596_s24 = scalar_lea.hbm %s99_s18, 16  ;;  %p599_p5 = scmp.lt.s32.totalorder %s99_s18, %s936_s1 }
  0x52   : > { %p597_p4 = scmp.ne.s32.totalorder %s99_s18, %s596_s24  ;;  %p600_p6 = scmp.lt.s32.totalorder %s796_s5, %s596_s24 }
  0x54   : > { %p601_p7 = por %p600_p6, %p599_p5 }
  0x56   : > { %p602_p8 = pnand %p601_p7, %p597_p4 }
  0x58   : > { %605 = shalt.err (!%p602_p8)  }
  0x59   : > { %s606_s22 = scalar_lea.vmem %s834_s3, 16  ;;  %p611_p10 = scmp.lt.s32.totalorder %s834_s3, %s804_s10 }
  0x5a   : > { %p607_p9 = scmp.ne.s32.totalorder %s834_s3, %s606_s22  ;;  %p612_p11 = scmp.lt.s32.totalorder %s807_s11, %s606_s22 }
  0x5c   : > { %p613_p12 = por %p612_p11, %p611_p10 }
  0x5e   : > { %p614_p13 = pnand %p613_p12, %p607_p9 }
  0x60   : > { %617 = shalt.err (!%p614_p13)  }
  0x61   : > { %111 = dma.hbm_to_vmem [thread:$0]  %s99_s18, 16, %s834_s3, %s791_s29 }
  0x62   : > { %s470_s27 = sshll.u32 %s839_s0, 4  ;;  %s50_s6 = sld [smem:[#allocation3 + %s49_s20]] }
  0x63   : > { %s113_s9 = scalar_lea.hbm %s936_s1, %s470_s27  ;;  %s443_s14 = scalar_lea.vmem %s777_s17, 5 [#allocation6] }
  0x64   : > { %s618_s15 = scalar_lea.hbm %s113_s9, 16  ;;  %p621_p1 = scmp.lt.s32.totalorder %s113_s9, %s936_s1 }
  0x65   : > { %p619_p0 = scmp.ne.s32.totalorder %s113_s9, %s618_s15  ;;  %p622_p2 = scmp.lt.s32.totalorder %s796_s5, %s618_s15 }
  0x67   : > { %p623_p3 = por %p622_p2, %p621_p1 }
  0x69   : > { %p624_p4 = pnand %p623_p3, %p619_p0 }
  0x6b   : > { %627 = shalt.err (!%p624_p4)  }
  0x6c   : > { %s628_s3 = scalar_lea.vmem %s853_s23, 16  ;;  %p633_p6 = scmp.lt.s32.totalorder %s853_s23, %s804_s10 }
  0x6d   : > { %p629_p5 = scmp.ne.s32.totalorder %s853_s23, %s628_s3  ;;  %p634_p7 = scmp.lt.s32.totalorder %s807_s11, %s628_s3 }
  0x6f   : > { %p635_p8 = por %p634_p7, %p633_p6 }
  0x71   : > { %p636_p9 = pnand %p635_p8, %p629_p5 }
  0x73   : > { %639 = shalt.err (!%p636_p9)  }
  0x74   : > { %125 = dma.hbm_to_vmem [thread:$0]  %s113_s9, 16, %s853_s23, %s791_s29 }
  0x75   : > { %s136_s0 = sshll.u32 %s443_s14, 4  ;;  %s51_s16 = sadd.s32 6, %s770_s13  ;;  %s137_s0 = int_to_ptr.vmem [resolvable:$true] %s136_s0 }
  0x76   : > { %s52_s20 = sld [smem:[#allocation3 + %s51_s16]]  ;;  %s448_s21 = scalar_lea.vmem %s777_s17, 6 [#allocation6] }
  0x77   : > { %s53_s25 = sadd.s32 7, %s770_s13  ;;  %s472_s26 = sshll.u32 %s50_s6, 4 }
  0x78   : > { %s150_s18 = sshll.u32 %s448_s21, 4  ;;  %s127_s4 = scalar_lea.hbm %s936_s1, %s472_s26  ;;  %s888_s18 = int_to_ptr.vmem [resolvable:$true] %s150_s18 }
  0x79   : > { %s640_s22 = scalar_lea.hbm %s127_s4, 16  ;;  %p643_p11 = scmp.lt.s32.totalorder %s127_s4, %s936_s1 }
  0x7a   : > { %p641_p10 = scmp.ne.s32.totalorder %s127_s4, %s640_s22  ;;  %p644_p12 = scmp.lt.s32.totalorder %s796_s5, %s640_s22 }
  0x7c   : > { %p645_p13 = por %p644_p12, %p643_p11 }
  0x7e   : > { %p646_p0 = pnand %p645_p13, %p641_p10 }
  0x80   : > { %649 = shalt.err (!%p646_p0)  }
  0x81   : > { %s650_s23 = scalar_lea.vmem %s137_s0, 16  ;;  %p655_p2 = scmp.lt.s32.totalorder %s137_s0, %s804_s10 }
  0x82   : > { %p651_p1 = scmp.ne.s32.totalorder %s137_s0, %s650_s23  ;;  %p656_p3 = scmp.lt.s32.totalorder %s807_s11, %s650_s23 }
  0x84   : > { %p657_p4 = por %p656_p3, %p655_p2 }
  0x86   : > { %p658_p5 = pnand %p657_p4, %p651_p1 }
  0x88   : > { %661 = shalt.err (!%p658_p5)  }
  0x89   : > { %139 = dma.hbm_to_vmem [thread:$0]  %s127_s4, 16, %s137_s0, %s791_s29 }
  0x8a   : > { %s54_s13 = sld [smem:[#allocation3 + %s53_s25]]  ;;  %s453_s6 = scalar_lea.vmem %s777_s17, 7 [#allocation6] }
  0x8b   : > { %s474_s8 = sshll.u32 %s52_s20, 4  ;;  %s164_s19 = sshll.u32 %s453_s6, 4  ;;  %s165_s19 = int_to_ptr.vmem [resolvable:$true] %s164_s19 }
  0x8c   : > { %s141_s15 = scalar_lea.hbm %s936_s1, %s474_s8 }
  0x8d   : > { %s662_s28 = scalar_lea.hbm %s141_s15, 16  ;;  %p665_p7 = scmp.lt.s32.totalorder %s141_s15, %s936_s1 }
  0x8e   : > { %p663_p6 = scmp.ne.s32.totalorder %s141_s15, %s662_s28  ;;  %p666_p8 = scmp.lt.s32.totalorder %s796_s5, %s662_s28 }
  0x90   : > { %p667_p9 = por %p666_p8, %p665_p7 }
  0x92   : > { %p668_p10 = pnand %p667_p9, %p663_p6 }
  0x94   : > { %671 = shalt.err (!%p668_p10)  }
  0x95   : > { %s672_s17 = scalar_lea.vmem %s888_s18, 16  ;;  %p677_p12 = scmp.lt.s32.totalorder %s888_s18, %s804_s10 }
  0x96   : > { %p673_p11 = scmp.ne.s32.totalorder %s888_s18, %s672_s17  ;;  %p678_p13 = scmp.lt.s32.totalorder %s807_s11, %s672_s17 }
  0x98   : > { %p679_p0 = por %p678_p13, %p677_p12 }
  0x9a   : > { %p680_p1 = pnand %p679_p0, %p673_p11 }
  0x9c   : > { %683 = shalt.err (!%p680_p1)  }
  0x9d   : > { %153 = dma.hbm_to_vmem [thread:$0]  %s141_s15, 16, %s888_s18, %s791_s29 }
  0x9e   : > { %s476_s0 = sshll.u32 %s54_s13, 4 }
  0x9f   : > { %s155_s25 = scalar_lea.hbm %s936_s1, %s476_s0 }
  0xa0   : > { %s684_s26 = scalar_lea.hbm %s155_s25, 16  ;;  %p687_p3 = scmp.lt.s32.totalorder %s155_s25, %s936_s1 }
  0xa1   : > { %p685_p2 = scmp.ne.s32.totalorder %s155_s25, %s684_s26  ;;  %p688_p4 = scmp.lt.s32.totalorder %s796_s5, %s684_s26 }
  0xa3   : > { %p689_p5 = por %p688_p4, %p687_p3 }
  0xa5   : > { %p690_p6 = pnand %p689_p5, %p685_p2 }
  0xa7   : > { %693 = shalt.err (!%p690_p6)  }
  0xa8   : > { %s694_s4 = scalar_lea.vmem %s165_s19, 16  ;;  %p699_p8 = scmp.lt.s32.totalorder %s165_s19, %s804_s10 }
  0xa9   : > { %p695_p7 = scmp.ne.s32.totalorder %s165_s19, %s694_s4  ;;  %p700_p9 = scmp.lt.s32.totalorder %s807_s11, %s694_s4 }
  0xab   : > { %p701_p10 = por %p700_p9, %p699_p8 }
  0xad   : > { %p702_p11 = pnand %p701_p10, %p695_p7 }
  0xaf   : > { %705 = shalt.err (!%p702_p11)  }
  0xb0   : > { %167 = dma.hbm_to_vmem [thread:$0]  %s155_s25, 16, %s165_s19, %s791_s29 }
  0xb1   : > { %s26_s12 = sadd.s32 1, %s740_s12  }
  0xb2   : > { %p23_p12 = scmp.ge.s32.totalorder %s26_s12, 2  }
  0xb4   :  { %25 = sbr.rel (!%p23_p12) target bundleno = 7 (0x7), region = 116 }
  0xb9   :  { %732 = dma.done.wait [#allocation2], 128 }
  0xba   :  { %733 = vsyncadd [#allocation2], 4294967168 }
  0xbb   :  { %734 = dma.done.wait [#allocation2 + $0x1], 128 }
  0xbc   :  { %735 = vsyncadd [#allocation2 + $0x1], 4294967168  ;;  %p707_p13 = scmp.ne.s32.totalorder %s804_s10, %s807_s11  ;;  %p711_p0 = scmp.lt.s32.totalorder %s804_s10, %s804_s10 }
  0xbd   :  { %p712_p1 = scmp.lt.s32.totalorder %s807_s11, %s807_s11 }
  0xbf   :  { %p713_p2 = por %p712_p1, %p711_p0 }
  0xc1   :  { %p714_p3 = pnand %p713_p2, %p707_p13 }
  0xc3   :  { %717 = shalt.err (!%p714_p3)
}
  0xc4   :  { %s744_s29 = smov 128   ;;  %s745_s12 = smov 8  }
  0xc5   :  { %185 = dma.vmem_to_hbm [thread:$0]  %s804_s10, 256, %s937_s2, [#allocation4], %s744_s29, %s744_s29, %s745_s12  }
  0xc6   :  { %736 = dma.done.wait [#allocation4], 256  }
  0xc7   :  { %737 = vsyncadd [#allocation4], 4294967040 }
  0xc8   :  { %189 = vsyncpa [#allocation4], 1 }
  0xc9   :  { %190 = vsyncpa [#allocation5], 1 }
  0xca   :  { %191 = vsyncmov [#allocation2] }
  0xcd   :  { %s192_s18 = vpop.sfrf %191 }
  0xce   :  { %p478_p4 = scmp.ne.s32.totalorder %s192_s18, 0 }
  0xd0   :  { %196 = shalt.err (%p478_p4)  }
  0xd1   :  { %198 = vsyncmov [#allocation2 + $0x1] }
  0xd4   :  { %s199_s11 = vpop.sfrf %198 }
  0xd5   :  { %p479_p5 = scmp.ne.s32.totalorder %s199_s11, 0 }
  0xd7   :  { %203 = shalt.err (%p479_p5)  }
  0xd8   :  { %205 = vsyncmov [#allocation2 + $0x2] }
  0xdb   :  { %s206_s22 = vpop.sfrf %205 }
  0xdc   :  { %p480_p6 = scmp.ne.s32.totalorder %s206_s22, 0 }
  0xde   :  { %210 = shalt.err (%p480_p6)  }
  0xdf   :  { %212 = vsyncmov [#allocation2 + $0x3] }
  0xe2   :  { %s213_s27 = vpop.sfrf %212 }
  0xe3   :  { %p481_p7 = scmp.ne.s32.totalorder %s213_s27, 0 }
  0xe5   :  { %217 = shalt.err (%p481_p7)  }
  0xe6   :  { %219 = vsyncmov [#allocation2 + $0x4] }
  0xe9   :  { %s220_s2 = vpop.sfrf %219 }
  0xea   :  { %p482_p8 = scmp.ne.s32.totalorder %s220_s2, 0 }
  0xec   :  { %224 = shalt.err (%p482_p8)  }
  0xed   :  { %226 = vsyncmov [#allocation2 + $0x5] }
  0xf0   :  { %s227_s10 = vpop.sfrf %226 }
  0xf1   :  { %p483_p9 = scmp.ne.s32.totalorder %s227_s10, 0 }
  0xf3   :  { %231 = shalt.err (%p483_p9)  }
  0xf4   :  { %233 = vsyncmov [#allocation2 + $0x6] }
  0xf7   :  { %s234_s7 = vpop.sfrf %233 }
  0xf8   :  { %p484_p10 = scmp.ne.s32.totalorder %s234_s7, 0 }
  0xfa   :  { %238 = shalt.err (%p484_p10)  }
  0xfb   :  { %240 = vsyncmov [#allocation2 + $0x7] }
  0xfe   :  { %s241_s23 = vpop.sfrf %240 }
  0xff   :  { %p485_p11 = scmp.ne.s32.totalorder %s241_s23, 0 }
 0x101   :  { %245 = shalt.err (%p485_p11)  }
 0x102   :  { %247 = vsyncmov [#allocation2 + $0x8] }
 0x105   :  { %s248_s13 = vpop.sfrf %247 }
 0x106   :  { %p486_p12 = scmp.ne.s32.totalorder %s248_s13, 0 }
 0x108   :  { %252 = shalt.err (%p486_p12)  }
 0x109   :  { %254 = vsyncmov [#allocation2 + $0x9] }
 0x10c   :  { %s255_s6 = vpop.sfrf %254 }
 0x10d   :  { %p487_p13 = scmp.ne.s32.totalorder %s255_s6, 0 }
 0x10f   :  { %259 = shalt.err (%p487_p13)  }
 0x110   :  { %261 = vsyncmov [#allocation2 + $0xa] }
 0x113   :  { %s262_s8 = vpop.sfrf %261 }
 0x114   :  { %p488_p0 = scmp.ne.s32.totalorder %s262_s8, 0 }
 0x116   :  { %266 = shalt.err (%p488_p0)  }
 0x117   :  { %268 = vsyncmov [#allocation2 + $0xb] }
 0x11a   :  { %s269_s9 = vpop.sfrf %268 }
 0x11b   :  { %p489_p1 = scmp.ne.s32.totalorder %s269_s9, 0 }
 0x11d   :  { %273 = shalt.err (%p489_p1)  }
 0x11e   :  { %275 = vsyncmov [#allocation2 + $0xc] }
 0x121   :  { %s276_s14 = vpop.sfrf %275 }
 0x122   :  { %p490_p2 = scmp.ne.s32.totalorder %s276_s14, 0 }
 0x124   :  { %280 = shalt.err (%p490_p2)  }
 0x125   :  { %282 = vsyncmov [#allocation2 + $0xd] }
 0x128   :  { %s283_s15 = vpop.sfrf %282 }
 0x129   :  { %p491_p3 = scmp.ne.s32.totalorder %s283_s15, 0 }
 0x12b   :  { %287 = shalt.err (%p491_p3)  }
 0x12c   :  { %289 = vsyncmov [#allocation2 + $0xe] }
 0x12f   :  { %s290_s19 = vpop.sfrf %289 }
 0x130   :  { %p492_p4 = scmp.ne.s32.totalorder %s290_s19, 0 }
 0x132   :  { %294 = shalt.err (%p492_p4)  }
 0x133   :  { %296 = vsyncmov [#allocation2 + $0xf] }
 0x136   :  { %s297_s28 = vpop.sfrf %296 }
 0x137   :  { %p493_p5 = scmp.ne.s32.totalorder %s297_s28, 0 }
 0x139   :  { %301 = shalt.err (%p493_p5)  }
 0x13a   :  { %303 = vsyncmov [#allocation2 + $0x10] }
 0x13d   :  { %s304_s3 = vpop.sfrf %303 }
 0x13e   :  { %p494_p6 = scmp.ne.s32.totalorder %s304_s3, 0 }
 0x140   :  { %308 = shalt.err (%p494_p6)  }
 0x141   :  { %310 = vsyncmov [#allocation2 + $0x11] }
 0x144   :  { %s311_s16 = vpop.sfrf %310 }
 0x145   :  { %p495_p7 = scmp.ne.s32.totalorder %s311_s16, 0 }
 0x147   :  { %315 = shalt.err (%p495_p7)  }
 0x148   :  { %317 = vsyncmov [#allocation2 + $0x12] }
 0x14b   :  { %s318_s17 = vpop.sfrf %317 }
 0x14c   :  { %p496_p8 = scmp.ne.s32.totalorder %s318_s17, 0 }
 0x14e   :  { %322 = shalt.err (%p496_p8)  }
 0x14f   :  { %324 = vsyncmov [#allocation2 + $0x13] }
 0x152   :  { %s325_s0 = vpop.sfrf %324 }
 0x153   :  { %p497_p9 = scmp.ne.s32.totalorder %s325_s0, 0 }
 0x155   :  { %329 = shalt.err (%p497_p9)  }
 0x156   :  { %331 = vsyncmov [#allocation2 + $0x14] }
 0x159   :  { %s332_s20 = vpop.sfrf %331 }
 0x15a   :  { %p498_p10 = scmp.ne.s32.totalorder %s332_s20, 0 }
 0x15c   :  { %336 = shalt.err (%p498_p10)  }
 0x15d   :  { %338 = vsyncmov [#allocation2 + $0x15] }
 0x160   :  { %s339_s21 = vpop.sfrf %338 }
 0x161   :  { %p499_p11 = scmp.ne.s32.totalorder %s339_s21, 0 }
 0x163   :  { %343 = shalt.err (%p499_p11)  }
 0x164   :  { %345 = vsyncmov [#allocation2 + $0x16] }
 0x167   :  { %s346_s25 = vpop.sfrf %345 }
 0x168   :  { %p500_p12 = scmp.ne.s32.totalorder %s346_s25, 0 }
 0x16a   :  { %350 = shalt.err (%p500_p12)  }
 0x16b   :  { %352 = vsyncmov [#allocation2 + $0x17] }
 0x16e   :  { %s353_s26 = vpop.sfrf %352 }
 0x16f   :  { %p501_p13 = scmp.ne.s32.totalorder %s353_s26, 0 }
 0x171   :  { %357 = shalt.err (%p501_p13)  }
 0x172   :  { %359 = vsyncmov [#allocation2 + $0x18] }
 0x175   :  { %s360_s24 = vpop.sfrf %359 }
 0x176   :  { %p502_p0 = scmp.ne.s32.totalorder %s360_s24, 0 }
 0x178   :  { %364 = shalt.err (%p502_p0)  }
 0x179   :  { %366 = vsyncmov [#allocation2 + $0x19] }
 0x17c   :  { %s367_s30 = vpop.sfrf %366 }
 0x17d   :  { %p503_p1 = scmp.ne.s32.totalorder %s367_s30, 0 }
 0x17f   :  { %371 = shalt.err (%p503_p1)  }
 0x180   :  { %373 = vsyncmov [#allocation2 + $0x1a] }
 0x183   :  { %s374_s4 = vpop.sfrf %373 }
 0x184   :  { %p504_p2 = scmp.ne.s32.totalorder %s374_s4, 0 }
 0x186   :  { %378 = shalt.err (%p504_p2)  }
 0x187   :  { %380 = vsyncmov [#allocation2 + $0x1b] }
 0x18a   :  { %s381_s29 = vpop.sfrf %380 }
 0x18b   :  { %p505_p3 = scmp.ne.s32.totalorder %s381_s29, 0 }
 0x18d   :  { %385 = shalt.err (%p505_p3)  }
 0x18e   :  { %387 = vsyncmov [#allocation2 + $0x1c] }
 0x191   :  { %s388_s12 = vpop.sfrf %387 }
 0x192   :  { %p506_p4 = scmp.ne.s32.totalorder %s388_s12, 0 }
 0x194   :  { %392 = shalt.err (%p506_p4)  }
 0x195   :  { %394 = vsyncmov [#allocation2 + $0x1d] }
 0x198   :  { %s395_s5 = vpop.sfrf %394 }
 0x199   :  { %p507_p5 = scmp.ne.s32.totalorder %s395_s5, 0 }
 0x19b   :  { %399 = shalt.err (%p507_p5)  }
 0x19c   :  { %401 = vsyncmov [#allocation2 + $0x1e] }
 0x19f   :  { %s402_s1 = vpop.sfrf %401 }
 0x1a0   :  { %p508_p6 = scmp.ne.s32.totalorder %s402_s1, 0 }
 0x1a2   :  { %406 = shalt.err (%p508_p6)  }
 0x1a3   :  { %408 = vsyncmov [#allocation2 + $0x1f] }
 0x1a6   :  { %s409_s18 = vpop.sfrf %408 }
 0x1a7   :  { %p509_p7 = scmp.ne.s32.totalorder %s409_s18, 0 }
 0x1a9   :  { %413 = shalt.err (%p509_p7)  }

</bundles_post_ra>
